<compile_context>
chip_gen: v5e
topology: v5e:2x2
jax: 0.10.0
libtpu: 0.0.40
codegen_flags: <defaults>
</compile_context>

<pallas_src>
import functools
import math

import jax
import jax.numpy as jnp
import numpy as np
from jax.experimental import pallas as pl
from jax.experimental.pallas import tpu as pltpu


# --------------------------------------------------------------------------- #
# In-kernel helper: softmax gates + top-1 / top-2 one-hot masks.
# --------------------------------------------------------------------------- #
def _softmax_and_top2(x):
    ts, e = x.shape
    mx = jnp.max(x, axis=-1, keepdims=True)
    ex = jnp.exp(x - mx)
    gates = ex / jnp.sum(ex, axis=-1, keepdims=True)              # (TS, E) f32

    eidx = jax.lax.broadcasted_iota(jnp.int32, (ts, e), 1)

    # top-1 on raw x (ties -> lowest index, matching torch argmax/topk)
    top1 = jnp.min(jnp.where(x == mx, eidx, e), axis=-1, keepdims=True)
    mask1 = (eidx == top1).astype(jnp.float32)

    # top-2 with the top-1 column masked out
    x2 = jnp.where(mask1 > 0.0, -jnp.inf, x)
    mx2 = jnp.max(x2, axis=-1, keepdims=True)
    top2 = jnp.min(jnp.where(x2 == mx2, eidx, e), axis=-1, keepdims=True)
    mask2 = (eidx == top2).astype(jnp.float32)

    return gates, mask1, mask2, eidx


# --------------------------------------------------------------------------- #
# Pallas kernel: capacity masking, positions, lane-dense combine + int8 mask.
# --------------------------------------------------------------------------- #
def _top2_combine_kernel(x_ref, off_ref, ltri_ref, cw_ref, sm_ref, *, capacity):
    x = x_ref[...].astype(jnp.float32)                            # (TS, E)
    ts, e = x.shape
    ec = e * capacity
    gates, mask1, mask2, eidx = _softmax_and_top2(x)

    off = off_ref[0]                                              # (2, E) f32
    off1 = off[0:1, :]                                            # excl. prefix of mask1
    off2 = off[1:2, :]                                            # excl. prefix of mask2 + total(mask1)

    # Within-tile inclusive cumsum over tokens: resident bf16 lower-triangular
    # matrix (fetched once thanks to the constant index_map), two skinny MXU
    # matmuls with exact f32 accumulation of 0/1 inputs.
    ltri = ltri_ref[...]                                          # (TS, TS) bf16
    csum1 = jnp.dot(ltri, mask1.astype(jnp.bfloat16),
                    preferred_element_type=jnp.float32)
    csum2 = jnp.dot(ltri, mask2.astype(jnp.bfloat16),
                    preferred_element_type=jnp.float32)

    loc1 = csum1 - 1.0 + off1                                     # global positions
    loc2 = csum2 - 1.0 + off2

    cap_f = jnp.float32(capacity)
    m1 = mask1 * (loc1 < cap_f).astype(jnp.float32)               # capacity-capped masks
    m2 = mask2 * (loc2 < cap_f).astype(jnp.float32)

    eidxf = eidx.astype(jnp.float32)
    # Per-token scalars (exactly one nonzero term per row, or all-zero if dropped).
    v1 = jnp.sum(m1 * gates, axis=1, keepdims=True)               # gate value
    v2 = jnp.sum(m2 * gates, axis=1, keepdims=True)
    # Flattened (expert, slot) key: expert*capacity + slot (exact in f32 < 2^24).
    t1 = jnp.sum(m1 * (eidxf * cap_f + loc1), axis=1, keepdims=True)
    t2 = jnp.sum(m2 * (eidxf * cap_f + loc2), axis=1, keepdims=True)

    # Lane-dense combine: column j of (TS, E*C) is (expert j//C, slot j%C).
    # One comparison per candidate against the flat column iota — no integer
    # division, no (TS, E*C) int32 temporaries.
    jcol = jax.lax.broadcasted_iota(jnp.int32, (1, ec), 1).astype(jnp.float32)
    combine = (jnp.where(jcol == t1, v1, 0.0) +
               jnp.where(jcol == t2, v2, 0.0))                    # (TS, E*C) f32

    cw_ref[...] = combine.astype(cw_ref.dtype)
    # Dropped tokens have v == 0, so their spurious key-0 match contributes
    # nothing; deriving the mask from `combine != 0` keeps it correct.
    sm_ref[...] = (combine != 0.0).astype(jnp.int8)


# --------------------------------------------------------------------------- #
# Wrapper helpers.
# --------------------------------------------------------------------------- #
def _round_up(v, m):
    return (v + m - 1) // m * m


def _vmem_limit_bytes():
    cap = 64 * 1024 * 1024                 # conservative fallback (v7x physical)
    try:
        info = pltpu.get_tpu_info()
        cap = int(getattr(info, "vmem_capacity_bytes", cap))
    except Exception:                      # not on TPU / older runtime
        pass
    # Leave headroom for compiler-internal scratch: v7x -> 48 MiB, v5e/v6e -> 112 MiB.
    return max(32 * 1024 * 1024, cap - 16 * 1024 * 1024)


def _pick_block_tokens(s, e, capacity, budget_bytes):
    """Largest multiple-of-32 token tile dividing S whose per-step footprint
    (lane padding + resident triangle + double-buffered outputs + big f32
    temporaries) fits the generation-aware VMEM budget."""
    ec_pad = _round_up(e * capacity, 128)

    def step_bytes(ts):
        tsp = _round_up(ts, 8)
        x_b = 2 * tsp * 128 * 4                 # input block (lane-padded), double-buffered
        tri_b = 2 * tsp * tsp * 2               # resident bf16 lower-triangular input
        out_b = 2 * tsp * ec_pad * (4 + 1)      # combine f32 + int8 mask, double-buffered
        tmp_n = 12 * tsp * 128 * 4              # (TS, E)-sized f32 temporaries, lane-padded
        tmp_w = 3 * tsp * ec_pad * 4            # (TS, E*C)-sized f32 temporaries
        return x_b + tri_b + out_b + tmp_n + tmp_w

    best = None
    ts = 32
    while ts <= min(s, 2048):
        if s % ts == 0 and step_bytes(ts) <= budget_bytes:
            best = ts
        ts += 32
    if best is not None:
        return best
    # TODO(synk): awkward S with no fitting multiple-of-32 divisor falls back to
    # a single full-S tile; very large awkward S would need a remainder-tile path.
    return s


def _tile_stats(x, block_tokens):
    """Per-tile per-expert sums of gates / mask1 / mask2 in plain JAX.
    Working set is only O(S*E), so XLA handles this in a few fused ops — cheaper
    than a dedicated Pallas pass paying per-grid-step overhead on 8/128 lanes."""
    s, e = x.shape
    n = s // block_tokens
    xf = x.astype(jnp.float32)
    gates = jax.nn.softmax(xf, axis=-1)
    top1 = jnp.argmax(xf, axis=-1)
    m1 = jax.nn.one_hot(top1, e, dtype=jnp.float32)
    top2 = jnp.argmax(jnp.where(m1 > 0.0, -jnp.inf, xf), axis=-1)
    m2 = jax.nn.one_hot(top2, e, dtype=jnp.float32)
    sum_g = jnp.sum(gates.reshape(n, block_tokens, e), axis=1)    # (T, E)
    c1 = jnp.sum(m1.reshape(n, block_tokens, e), axis=1)
    c2 = jnp.sum(m2.reshape(n, block_tokens, e), axis=1)
    return sum_g, c1, c2


# --------------------------------------------------------------------------- #
# Public wrapper (forward pass of Top2Router, noisy_func=None).
# --------------------------------------------------------------------------- #
def top2_router(x, capacity_factor=1.0, block_tokens=None,
                combine_dtype=jnp.float32):
    s, e = x.shape
    capacity = math.ceil(2 * capacity_factor * s / e)
    ec = e * capacity

    vmem_limit = _vmem_limit_bytes()
    budget = max(16 * 1024 * 1024, vmem_limit - 8 * 1024 * 1024)

    if (block_tokens is not None and s % block_tokens == 0
            and (block_tokens == s or block_tokens % 32 == 0)):
        ts = block_tokens
    else:
        ts = _pick_block_tokens(s, e, capacity, budget)
    num_tiles = s // ts

    # ---- O(S*E) stats, offsets and aux loss (plain JAX glue) ----------------
    sum_g, c1, c2 = _tile_stats(x, ts)
    total1 = jnp.sum(c1, axis=0)
    total2 = jnp.sum(c2, axis=0)
    # TODO(synk): torch returns exp_counts as int64 on CPU; int32 device array here.
    exp_counts = (total1 + total2).astype(jnp.int32)
    me = jnp.sum(sum_g, axis=0) / s
    ce = (total1 + total2) / s
    # TODO(synk): torch pushes l_aux into the global moe_env; returned here instead.
    l_aux = (e / 2.0) * jnp.sum(me * ce)

    off1 = jnp.cumsum(c1, axis=0) - c1                     # exclusive tile prefix (mask1)
    off2 = jnp.cumsum(c2, axis=0) - c2 + total1[None, :]   # prefix (mask2) + total(mask1)
    offsets = jnp.stack([off1, off2], axis=1)              # (T, 2, E) f32, exact ints

    # Resident lower-triangular matrix for the within-tile MXU cumsum.
    ltri = jnp.tril(jnp.ones((ts, ts), dtype=jnp.bfloat16))

    cparams = pltpu.CompilerParams(
        dimension_semantics=("parallel",),        # megacore-shards tiles on v7x
        vmem_limit_bytes=vmem_limit,
    )

    kernel = functools.partial(_top2_combine_kernel, capacity=capacity)
    combine2d, secmask2d = pl.pallas_call(
        kernel,
        grid=(num_tiles,),
        in_specs=[pl.BlockSpec((ts, e), lambda i: (i, 0)),
                  pl.BlockSpec((1, 2, e), lambda i: (i, 0, 0)),
                  pl.BlockSpec((ts, ts), lambda i: (0, 0))],   # constant -> fetched once
        out_specs=(pl.BlockSpec((ts, ec), lambda i: (i, 0)),
                   pl.BlockSpec((ts, ec), lambda i: (i, 0))),
        out_shape=(jax.ShapeDtypeStruct((s, ec), combine_dtype),
                   jax.ShapeDtypeStruct((s, ec), jnp.int8)),
        compiler_params=cparams,
    )(x, offsets, ltri)

    # TODO(synk): the (S, E*C) -> (S, E, C) reshape is an XLA relayout pass; a
    # consumer that accepts the flat lane-dense layout should use combine2d directly.
    combine = combine2d.reshape(s, e, capacity)
    # Dispatch mask stays int8 end-to-end (nonzero == routed); no bool-cast pass.
    sec_mask = secmask2d.reshape(s, e, capacity)
    return combine, sec_mask, exp_counts, l_aux


# --------------------------------------------------------------------------- #
# Pure-JAX reference mirroring the torch forward (for validation).
# --------------------------------------------------------------------------- #
def _top2_router_ref(x, capacity_factor=1.0):
    s, e = x.shape
    logits = jax.nn.softmax(x, axis=-1)
    capacity = math.ceil(2 * capacity_factor * s / e)
    top1 = jnp.argmax(logits, axis=-1)
    mask1 = jax.nn.one_hot(top1, e, dtype=jnp.int32)
    masked = jnp.where(mask1.astype(bool), -jnp.inf, logits)
    top2 = jnp.argmax(masked, axis=-1)
    mask2 = jax.nn.one_hot(top2, e, dtype=jnp.int32)
    loss_mask = mask1 + mask2
    exp_counts = jnp.sum(loss_mask, axis=0)
    me = jnp.mean(logits, axis=0)
    ce = jnp.mean(loss_mask.astype(jnp.float32), axis=0)
    l_aux = e * jnp.sum(me * ce) / 2.0
    loc1 = jnp.cumsum(mask1, axis=0) - 1
    loc2 = jnp.cumsum(mask2, axis=0) - 1 + jnp.sum(mask1, axis=0, keepdims=True)
    mask1 = mask1 * (loc1 < capacity)
    mask2 = mask2 * (loc2 < capacity)
    w1 = mask1 * logits
    w2 = mask2 * logits
    p1 = jnp.sum(mask1 * loc1, axis=1)
    p2 = jnp.sum(mask2 * loc2, axis=1)
    sc1 = jax.nn.one_hot(p1, capacity, dtype=logits.dtype)
    sc2 = jax.nn.one_hot(p2, capacity, dtype=logits.dtype)
    cw = w1[:, :, None] * sc1[:, None, :] + w2[:, :, None] * sc2[:, None, :]
    return cw, cw != 0, exp_counts, l_aux


def _check(got, want):
    cw, sm, cnt, laux = got
    cw_r, sm_r, cnt_r, laux_r = want
    np.testing.assert_allclose(np.asarray(cw, dtype=np.float32),
                               np.asarray(cw_r), rtol=1e-5, atol=1e-6)
    np.testing.assert_array_equal(np.asarray(sm) != 0, np.asarray(sm_r))
    np.testing.assert_array_equal(np.asarray(cnt),
                                  np.asarray(cnt_r).astype(np.int32))
    np.testing.assert_allclose(float(laux), float(laux_r), rtol=1e-5, atol=1e-6)


if __name__ == "__main__":
    key = jax.random.PRNGKey(0)
    k1, k2 = jax.random.split(key)

    # Case 1: tiny single-tile config (8 tokens, 4 experts, capacity 4).
    x1 = jax.random.normal(k1, (8, 4), dtype=jnp.float32)
    out1 = top2_router(x1, capacity_factor=1.0)
    jax.block_until_ready(out1)
    _check(out1, _top2_router_ref(x1, capacity_factor=1.0))

    # Case 2: multi-tile config exercising the gridded path
    # (256 tokens, 8 experts, capacity 64, two token tiles of 128).
    x2 = jax.random.normal(k2, (256, 8), dtype=jnp.float32)
    out2 = top2_router(x2, capacity_factor=1.0, block_tokens=128)
    jax.block_until_ready(out2)
    _check(out2, _top2_router_ref(x2, capacity_factor=1.0))

    print("KERNEL_OK")
</pallas_src>

<mosaic_0001>
module attributes {stable_mosaic.version = 11 : i64} {
  func.func @_top2_combine_kernel(%arg0: i32, %arg1: memref<8x4xf32, #tpu.memory_space<vmem>>, %arg2: memref<1x2x4xf32, #tpu.memory_space<vmem>>, %arg3: memref<8x8xbf16, #tpu.memory_space<vmem>>, %arg4: memref<8x16xf32, #tpu.memory_space<vmem>>, %arg5: memref<8x16xi8, #tpu.memory_space<vmem>>) attributes {dimension_semantics = [#tpu.dimension_semantics<parallel>], iteration_bounds = array<i64: 1>, scalar_prefetch = 0 : i64, scratch_operands = 0 : i64, tpu.core_type = #tpu.core_type<tc>, window_params = [{transform_indices = @transform_0, window_bounds = array<i64: 8, 4>}, {transform_indices = @transform_1, window_bounds = array<i64: 1, 2, 4>}, {pipeline_mode = #tpu.pipeline_mode<synchronous>, transform_indices = @transform_2, window_bounds = array<i64: 8, 8>}, {transform_indices = @transform_3, window_bounds = array<i64: 8, 16>}, {transform_indices = @transform_4, window_bounds = array<i64: 8, 16>}]} {
    %c0 = arith.constant 0 : index
    %c0_0 = arith.constant 0 : index
    %0 = vector.load %arg1[%c0, %c0_0] : memref<8x4xf32, #tpu.memory_space<vmem>>, vector<8x4xf32>
    %cst = arith.constant dense<0xFF800000> : vector<8xf32>
    %1 = vector.multi_reduction <maximumf>, %0, %cst [1] : vector<8x4xf32> to vector<8xf32>
    %2 = vector.shape_cast %1 : vector<8xf32> to vector<8x1xf32>
    %3 = vector.broadcast %2 : vector<8x1xf32> to vector<8x4xf32>
    %4 = arith.subf %0, %3 : vector<8x4xf32>
    %5 = math.exp %4 : vector<8x4xf32>
    %cst_1 = arith.constant dense<0.000000e+00> : vector<8xf32>
    %6 = vector.multi_reduction <add>, %5, %cst_1 [1] : vector<8x4xf32> to vector<8xf32>
    %7 = vector.shape_cast %6 : vector<8xf32> to vector<8x1xf32>
    %8 = vector.broadcast %7 : vector<8x1xf32> to vector<8x4xf32>
    %9 = arith.divf %5, %8 : vector<8x4xf32>
    %10 = tpu.iota {dimensions = array<i32: 1>} : vector<8x4xi32>
    %11 = vector.broadcast %2 : vector<8x1xf32> to vector<8x4xf32>
    %12 = arith.cmpf oeq, %0, %11 : vector<8x4xf32>
    %c4_i32 = arith.constant 4 : i32
    %13 = vector.broadcast %c4_i32 : i32 to vector<8x4xi32>
    %14 = arith.select %12, %10, %13 : vector<8x4xi1>, vector<8x4xi32>
    %cst_2 = arith.constant dense<2147483647> : vector<8xi32>
    %15 = vector.multi_reduction <minsi>, %14, %cst_2 [1] : vector<8x4xi32> to vector<8xi32>
    %16 = vector.shape_cast %15 : vector<8xi32> to vector<8x1xi32>
    %17 = vector.broadcast %16 : vector<8x1xi32> to vector<8x4xi32>
    %18 = arith.cmpi eq, %10, %17 : vector<8x4xi32>
    %19 = arith.extui %18 : vector<8x4xi1> to vector<8x4xi32>
    %20 = arith.sitofp %19 : vector<8x4xi32> to vector<8x4xf32>
    %cst_3 = arith.constant 0.000000e+00 : f32
    %21 = vector.broadcast %cst_3 : f32 to vector<8x4xf32>
    %22 = arith.cmpf ogt, %20, %21 : vector<8x4xf32>
    %cst_4 = arith.constant 0xFF800000 : f32
    %23 = vector.broadcast %cst_4 : f32 to vector<8x4xf32>
    %24 = arith.select %22, %23, %0 : vector<8x4xi1>, vector<8x4xf32>
    %cst_5 = arith.constant dense<0xFF800000> : vector<8xf32>
    %25 = vector.multi_reduction <maximumf>, %24, %cst_5 [1] : vector<8x4xf32> to vector<8xf32>
    %26 = vector.shape_cast %25 : vector<8xf32> to vector<8x1xf32>
    %27 = vector.broadcast %26 : vector<8x1xf32> to vector<8x4xf32>
    %28 = arith.cmpf oeq, %24, %27 : vector<8x4xf32>
    %c4_i32_6 = arith.constant 4 : i32
    %29 = vector.broadcast %c4_i32_6 : i32 to vector<8x4xi32>
    %30 = arith.select %28, %10, %29 : vector<8x4xi1>, vector<8x4xi32>
    %cst_7 = arith.constant dense<2147483647> : vector<8xi32>
    %31 = vector.multi_reduction <minsi>, %30, %cst_7 [1] : vector<8x4xi32> to vector<8xi32>
    %32 = vector.shape_cast %31 : vector<8xi32> to vector<8x1xi32>
    %33 = vector.broadcast %32 : vector<8x1xi32> to vector<8x4xi32>
    %34 = arith.cmpi eq, %10, %33 : vector<8x4xi32>
    %35 = arith.extui %34 : vector<8x4xi1> to vector<8x4xi32>
    %36 = arith.sitofp %35 : vector<8x4xi32> to vector<8x4xf32>
    %c0_8 = arith.constant 0 : index
    %c0_9 = arith.constant 0 : index
    %c0_10 = arith.constant 0 : index
    %37 = vector.load %arg2[%c0_8, %c0_9, %c0_10] : memref<1x2x4xf32, #tpu.memory_space<vmem>>, vector<1x2x4xf32>
    %38 = vector.shape_cast %37 : vector<1x2x4xf32> to vector<2x4xf32>
    %39 = vector.extract_strided_slice %38 {offsets = [0, 0], sizes = [1, 4], strides = [1, 1]} : vector<2x4xf32> to vector<1x4xf32>
    %40 = vector.extract_strided_slice %38 {offsets = [1, 0], sizes = [1, 4], strides = [1, 1]} : vector<2x4xf32> to vector<1x4xf32>
    %c0_11 = arith.constant 0 : index
    %c0_12 = arith.constant 0 : index
    %41 = vector.load %arg3[%c0_11, %c0_12] : memref<8x8xbf16, #tpu.memory_space<vmem>>, vector<8x8xbf16>
    %42 = arith.truncf %20 : vector<8x4xf32> to vector<8x4xbf16>
    %cst_13 = arith.constant dense<0.000000e+00> : vector<8x4xf32>
    %43 = tpu.matmul %41, %42, %cst_13 {dimension_numbers = #tpu.dot_dimension_numbers<[1], [0], [0], [1], [0, 0, 1, 1], [], []>} : vector<8x8xbf16>, vector<8x4xbf16>, vector<8x4xf32> -> vector<8x4xf32>
    %44 = arith.truncf %36 : vector<8x4xf32> to vector<8x4xbf16>
    %cst_14 = arith.constant dense<0.000000e+00> : vector<8x4xf32>
    %45 = tpu.matmul %41, %44, %cst_14 {dimension_numbers = #tpu.dot_dimension_numbers<[1], [0], [0], [1], [0, 0, 1, 1], [], []>} : vector<8x8xbf16>, vector<8x4xbf16>, vector<8x4xf32> -> vector<8x4xf32>
    %cst_15 = arith.constant 1.000000e+00 : f32
    %46 = vector.broadcast %cst_15 : f32 to vector<8x4xf32>
    %47 = arith.subf %43, %46 : vector<8x4xf32>
    %48 = vector.broadcast %39 : vector<1x4xf32> to vector<8x4xf32>
    %49 = arith.addf %47, %48 : vector<8x4xf32>
    %cst_16 = arith.constant 1.000000e+00 : f32
    %50 = vector.broadcast %cst_16 : f32 to vector<8x4xf32>
    %51 = arith.subf %45, %50 : vector<8x4xf32>
    %52 = vector.broadcast %40 : vector<1x4xf32> to vector<8x4xf32>
    %53 = arith.addf %51, %52 : vector<8x4xf32>
    %cst_17 = arith.constant 4.000000e+00 : f32
    %54 = vector.broadcast %cst_17 : f32 to vector<8x4xf32>
    %55 = arith.cmpf olt, %49, %54 : vector<8x4xf32>
    %56 = arith.extui %55 : vector<8x4xi1> to vector<8x4xi32>
    %57 = arith.sitofp %56 : vector<8x4xi32> to vector<8x4xf32>
    %58 = arith.mulf %20, %57 : vector<8x4xf32>
    %cst_18 = arith.constant 4.000000e+00 : f32
    %59 = vector.broadcast %cst_18 : f32 to vector<8x4xf32>
    %60 = arith.cmpf olt, %53, %59 : vector<8x4xf32>
    %61 = arith.extui %60 : vector<8x4xi1> to vector<8x4xi32>
    %62 = arith.sitofp %61 : vector<8x4xi32> to vector<8x4xf32>
    %63 = arith.mulf %36, %62 : vector<8x4xf32>
    %64 = arith.sitofp %10 : vector<8x4xi32> to vector<8x4xf32>
    %65 = arith.mulf %58, %9 : vector<8x4xf32>
    %cst_19 = arith.constant dense<0.000000e+00> : vector<8xf32>
    %66 = vector.multi_reduction <add>, %65, %cst_19 [1] : vector<8x4xf32> to vector<8xf32>
    %67 = vector.shape_cast %66 : vector<8xf32> to vector<8x1xf32>
    %68 = arith.mulf %63, %9 : vector<8x4xf32>
    %cst_20 = arith.constant dense<0.000000e+00> : vector<8xf32>
    %69 = vector.multi_reduction <add>, %68, %cst_20 [1] : vector<8x4xf32> to vector<8xf32>
    %70 = vector.shape_cast %69 : vector<8xf32> to vector<8x1xf32>
    %cst_21 = arith.constant 4.000000e+00 : f32
    %71 = vector.broadcast %cst_21 : f32 to vector<8x4xf32>
    %72 = arith.mulf %64, %71 : vector<8x4xf32>
    %73 = arith.addf %72, %49 : vector<8x4xf32>
    %74 = arith.mulf %58, %73 : vector<8x4xf32>
    %cst_22 = arith.constant dense<0.000000e+00> : vector<8xf32>
    %75 = vector.multi_reduction <add>, %74, %cst_22 [1] : vector<8x4xf32> to vector<8xf32>
    %76 = vector.shape_cast %75 : vector<8xf32> to vector<8x1xf32>
    %cst_23 = arith.constant 4.000000e+00 : f32
    %77 = vector.broadcast %cst_23 : f32 to vector<8x4xf32>
    %78 = arith.mulf %64, %77 : vector<8x4xf32>
    %79 = arith.addf %78, %53 : vector<8x4xf32>
    %80 = arith.mulf %63, %79 : vector<8x4xf32>
    %cst_24 = arith.constant dense<0.000000e+00> : vector<8xf32>
    %81 = vector.multi_reduction <add>, %80, %cst_24 [1] : vector<8x4xf32> to vector<8xf32>
    %82 = vector.shape_cast %81 : vector<8xf32> to vector<8x1xf32>
    %83 = tpu.iota {dimensions = array<i32: 1>} : vector<1x16xi32>
    %84 = arith.sitofp %83 : vector<1x16xi32> to vector<1x16xf32>
    %85 = vector.broadcast %84 : vector<1x16xf32> to vector<8x16xf32>
    %86 = vector.broadcast %76 : vector<8x1xf32> to vector<8x16xf32>
    %87 = arith.cmpf oeq, %85, %86 : vector<8x16xf32>
    %cst_25 = arith.constant 0.000000e+00 : f32
    %88 = vector.shape_cast %67 : vector<8x1xf32> to vector<8x1xf32>
    %89 = vector.broadcast %88 : vector<8x1xf32> to vector<8x16xf32>
    %90 = vector.broadcast %cst_25 : f32 to vector<8x16xf32>
    %91 = arith.select %87, %89, %90 : vector<8x16xi1>, vector<8x16xf32>
    %92 = vector.broadcast %84 : vector<1x16xf32> to vector<8x16xf32>
    %93 = vector.broadcast %82 : vector<8x1xf32> to vector<8x16xf32>
    %94 = arith.cmpf oeq, %92, %93 : vector<8x16xf32>
    %cst_26 = arith.constant 0.000000e+00 : f32
    %95 = vector.shape_cast %70 : vector<8x1xf32> to vector<8x1xf32>
    %96 = vector.broadcast %95 : vector<8x1xf32> to vector<8x16xf32>
    %97 = vector.broadcast %cst_26 : f32 to vector<8x16xf32>
    %98 = arith.select %94, %96, %97 : vector<8x16xi1>, vector<8x16xf32>
    %99 = arith.addf %91, %98 : vector<8x16xf32>
    %c0_27 = arith.constant 0 : index
    %c0_28 = arith.constant 0 : index
    %100 = vector.load %arg4[%c0_27, %c0_28] : memref<8x16xf32, #tpu.memory_space<vmem>>, vector<8x16xf32>
    tpu.vector_store %arg4[%c0_27, %c0_28], %99 {strides = array<i32>} : memref<8x16xf32, #tpu.memory_space<vmem>>, vector<8x16xf32>,
    %cst_29 = arith.constant 0.000000e+00 : f32
    %101 = vector.broadcast %cst_29 : f32 to vector<8x16xf32>
    %102 = arith.cmpf one, %99, %101 : vector<8x16xf32>
    %103 = arith.extui %102 : vector<8x16xi1> to vector<8x16xi8>
    %c0_30 = arith.constant 0 : index
    %c0_31 = arith.constant 0 : index
    %104 = vector.load %arg5[%c0_30, %c0_31] : memref<8x16xi8, #tpu.memory_space<vmem>>, vector<8x16xi8>
    tpu.vector_store %arg5[%c0_30, %c0_31], %103 {strides = array<i32>} : memref<8x16xi8, #tpu.memory_space<vmem>>, vector<8x16xi8>,
    return
  }
  func.func @transform_0(%arg0: i32) -> (i32, i32) {
    %c0_i32 = arith.constant 0 : i32
    %c0_i32_0 = arith.constant 0 : i32
    return %arg0, %c0_i32 : i32, i32
  }
  func.func @transform_1(%arg0: i32) -> (i32, i32, i32) {
    %c0_i32 = arith.constant 0 : i32
    %c0_i32_0 = arith.constant 0 : i32
    %c0_i32_1 = arith.constant 0 : i32
    return %arg0, %c0_i32, %c0_i32_0 : i32, i32, i32
  }
  func.func @transform_2(%arg0: i32) -> (i32, i32) {
    %c0_i32 = arith.constant 0 : i32
    %c0_i32_0 = arith.constant 0 : i32
    %c0_i32_1 = arith.constant 0 : i32
    return %c0_i32, %c0_i32_0 : i32, i32
  }
  func.func @transform_3(%arg0: i32) -> (i32, i32) {
    %c0_i32 = arith.constant 0 : i32
    %c0_i32_0 = arith.constant 0 : i32
    return %arg0, %c0_i32 : i32, i32
  }
  func.func @transform_4(%arg0: i32) -> (i32, i32) {
    %c0_i32 = arith.constant 0 : i32
    %c0_i32_0 = arith.constant 0 : i32
    return %arg0, %c0_i32 : i32, i32
  }
}

</mosaic_0001>

<bundles_post_ra>
// kernel: tpu_custom_call.1
= control target key start
LH: loop header
LB: loop body
LE: loop exit
PB: predicated region body
PF: predicated region fallthrough
CT: control target
= control target key end

     0   :  { %10 = vsyncpa [#allocation3], 0  ;;  %vm22_vm0 = vcmask 31744   ;;  %s358_s0 = inlined_call_operand.vmem [shape: f32[8,4], index: 0, kind: input, shape index: {}]   ;;  %s359_s1 = inlined_call_operand.vmem [shape: f32[1,2,4], index: 1, kind: input, shape index: {}]   ;;  %s360_s2 = inlined_call_operand.vmem [shape: bf16[8,8], index: 2, kind: input, shape index: {}]   ;;  %s361_s3 = inlined_call_operand.hbm [shape: f32[8,16], index: 3, kind: output, shape index: {0}]   ;;  %s362_s4 = inlined_call_operand.hbm [shape: s8[8,16], index: 4, kind: output, shape index: {1}]  }
   0x1   :  { %v21_v0 = vld [vmem:[%s358_s0] sm:$0xff] }
   0x2   :  { %11 = vsyncpa [#allocation5], 0  ;;  %v23_v1 = vsel %vm22_vm0, %v21_v0, -inf  ;;  %v47_v2 = vlaneseq  ;;  %v285_v22 = vmov 0.0   ;;  %vm101_vm4 = vcmask 1043456   ;;  %s192_s22 = sshll.u32 %s361_s3, 4  ;;  %s193_s22 = int_to_ptr.hbm [resolvable:$true] %s192_s22 }
   0x3   :  { %24 = vmax.xlane.f32.xlu0 %v23_v1  ;;  %v95_v28 = vld [vmem:[%s360_s2] sm:$0xf]  ;;  %vm97_vm6 = vcmask 64512   ;;  %s288_s23 = smov [#allocation4]   ;;  %s203_s3 = sshll.u32 %s362_s4, 4  ;;  %s204_s3 = int_to_ptr.hbm [resolvable:$true] %s203_s3 }
   0x4   :  { %v318_v3 = vand.u32 127, %v47_v2  ;;  %v94_v39 = vld [vmem:[%s359_s1] sm:$0x3]  ;;  %s286_s1 = smov [#allocation2]   ;;  %s201_s24 = sshll.u32 %s288_s23, 4  ;;  %s202_s24 = int_to_ptr.vmem [resolvable:$true] %s201_s24 }
   0x5   :  { %v136_v43 = vperm.slane %v94_v39, 0  ;;  %s190_s19 = sshll.u32 %s286_s1, 4  ;;  %s191_s19 = int_to_ptr.vmem [resolvable:$true] %s190_s19 }
   0x6   :  { %v337_v40 = vcvt.s32.f32 %v318_v3 }
   0x8   :  { %v158_v47 = vmul.f32 4.0, %v337_v40 }
  0x76   :  { %v25_v4 = vpop.xlane.xlu0 %24 }
  0x77   :  { %v26_v5 = vsub.f32 %v21_v0, %v25_v4  ;;  %vm49_vm1 = vcmp.eq.f32.partialorder %v21_v0, %v25_v4 }
  0x78   :  { %v50_v6 = vsel %vm49_vm1, %v318_v3, 4 }
  0x79   :  { %v27_v7 = vmul.f32 1.442695, %v26_v5  ;;  %v51_v8 = vsel %vm22_vm0, %v50_v6, 2147483647 }
  0x7a   :  { %v53_v9 = vshra.s32 %v51_v8, 16  ;;  %v52_v13 = vand.u32 65535, %v51_v8 }
  0x7b   :  { %229 = vpow2.f32 %v27_v7 }
  0x7c   :  { %v55_v10 = vcvt.s32.f32 %v53_v9  ;;  %v54_v15 = vcvt.s32.f32 %v52_v13 }
  0x7e   :  { %56 = vmin.xlane.f32.xlu0 %v55_v10 }
  0x81   :  { %v230_v11 = vpop.eup %229 }
  0x82   :  { %v29_v12 = vsel %vm22_vm0, %v230_v11, 0.0 }
  0x86   :  { %30 = vadd.xlane.f32.xlu0 %v29_v12 }
  0xf1   :  { %v57_v14 = vpop.xlane.xlu0 %56 }
  0xf2   :  { %vm58_vm2 = vcmp.eq.f32.partialorder %v55_v10, %v57_v14  ;;  %v63_v17 = vcvt.f32.s32 %v57_v14  ;;  %v139_v10 = vperm.slane %v94_v39, 1 }
  0xf3   :  { %v59_v16 = vsel %vm58_vm2, %v54_v15, inf }
  0xf4   :  { %60 = vmin.xlane.f32.xlu1 %v59_v16  ;;  %v64_v19 = vshll.u32 %v63_v17, 16 }
  0xf9   :  { %v31_v29 = vpop.xlane.xlu0 %30 }
  0xfa   :  { %231 = vrcp.f32 %v31_v29  ;;  %v43_v42 = vand.u32 2147483648, %v31_v29  ;;  %vm37_vm9 = vweird.f32 %v31_v29  ;;  %v41_v44 = vand.u32 2147483647, %v31_v29 }
  0xfc   :  { %v44_v49 = vor.u32 1.1754944e-38, %v43_v42  ;;  %vm42_vm11 = vcmp.eq.f32.partialorder %v41_v44, 8.507059e+37 }
 0x100   :  { %v232_v30 = vpop.eup %231 }
 0x101   :  { %v33_v31 = vmul.f32 %v232_v30, %v31_v29  ;;  %vm38_vm8 = vweird.f32 %v232_v30 }
 0x102   :  { %vm39_vm10 = vmor %vm37_vm9, %vm38_vm8 }
 0x103   :  { %v34_v33 = vsub.f32 1.0, %v33_v31 }
 0x105   :  { %v35_v37 = vmul.f32 %v232_v30, %v34_v33 }
 0x107   :  { %v36_v41 = vadd.f32 %v232_v30, %v35_v37 }
 0x109   :  { %v40_v48 = vsel %vm39_vm10, %v232_v30, %v36_v41 }
 0x10a   :  { %v45_v51 = vsel %vm42_vm11, %v44_v49, %v40_v48 }
 0x10b   :  { %v46_v55 = vmul.f32 %v230_v11, %v45_v51 }
 0x167   :  { %v61_v18 = vpop.xlane.xlu1 %60 }
 0x168   :  { %v62_v20 = vcvt.f32.s32 %v61_v18 }
 0x16a   :  { %v65_v21 = vadd.s32 %v64_v19, %v62_v20 }
 0x16c   :  { %vm66_vm3 = vcmp.eq.s32.totalorder %v318_v3, %v65_v21 }
 0x16d   :  { %v217_v23 = vsel %vm66_vm3, 1.0, %v285_v22  ;;  %vm174_vm3 = vcmask 130048  }
 0x16e   :  { %v96_v24 = vpack.c.bf16 %v217_v23, %v217_v23  ;;  %vm69_vm5 = vcmp.gt.f32.partialorder %v217_v23, 0.0 }
 0x16f   :  { %v70_v25 = vsel %vm69_vm5, -inf, %v21_v0  ;;  %vm183_vm5 = vcmask 123904  }
 0x170   :  { %v103_v26 = vsel %vm101_vm4, %v96_v24, 0  ;;  %v71_v27 = vsel %vm22_vm0, %v70_v25, -inf }
 0x171   :  { %112 = vmatpush.bf16.msra.mxu0 %v103_v26  ;;  %72 = vmax.xlane.f32.xlu1 %v71_v27 }
 0x174   :  { %219 = vmatmul.msk.bf16.vlgmr.msra.gmra.mxu0 %vm97_vm6, %v95_v28 }
 0x1e4   :  { %v73_v32 = vpop.xlane.xlu1 %72 }
 0x1e5   :  { %vm74_vm7 = vcmp.eq.f32.partialorder %v70_v25, %v73_v32 }
 0x1e6   :  { %v75_v34 = vsel %vm74_vm7, %v318_v3, 4 }
 0x1e7   :  { %v76_v35 = vsel %vm22_vm0, %v75_v34, 2147483647 }
 0x1e8   :  { %v78_v36 = vshra.s32 %v76_v35, 16  ;;  %v77_v61 = vand.u32 65535, %v76_v35 }
 0x1ea   :  { %v80_v38 = vcvt.s32.f32 %v78_v36  ;;  %v79_v63 = vcvt.s32.f32 %v77_v61 }
 0x1ec   :  { %81 = vmin.xlane.f32.xlu2 %v80_v38 }
 0x1f1   :  { %v114_v45 = vpop.f32.mrf.mxu0 }
 0x1f2   :  { %v221_v46 = vadd.f32 -1.0, %v114_v45 }
 0x1f4   :  { %v137_v50 = vadd.f32 %v221_v46, %v136_v43 }
 0x1f6   :  { %vm141_vm12 = vcmp.lt.f32.partialorder %v137_v50, 4.0  ;;  %v159_v52 = vadd.f32 %v158_v47, %v137_v50 }
 0x1f7   :  { %v223_v53 = vsel %vm141_vm12, 1.0, %v285_v22 }
 0x1f8   :  { %v144_v54 = vmul.f32 %v223_v53, %v217_v23 }
 0x1f9   :  { %v116_v56 = vpop.f32.mrf.mxu0 }
 0x1fa   :  { %v160_v57 = vmul.f32 %v159_v52, %v144_v54  ;;  %v150_v58 = vmul.f32 %v144_v54, %v46_v55 }
 0x1fc   :  { %v161_v59 = vsel %vm22_vm0, %v160_v57, 0.0  ;;  %v151_v60 = vsel %vm22_vm0, %v150_v58, 0.0 }
 0x1fd   :  { %162 = vadd.xlane.f32.xlu1 %v161_v59  ;;  %152 = vadd.xlane.f32.xlu0 %v151_v60 }
 0x25f   :  { %v82_v62 = vpop.xlane.xlu2 %81 }
 0x260   :  { %vm83_vm13 = vcmp.eq.f32.partialorder %v80_v38, %v82_v62  ;;  %v88_v1 = vcvt.f32.s32 %v82_v62 }
 0x261   :  { %v84_v0 = vsel %vm83_vm13, %v79_v63, inf }
 0x262   :  { %85 = vmin.xlane.f32.xlu2 %v84_v0  ;;  %v89_v4 = vshll.u32 %v88_v1, 16 }
 0x270   :  { %v163_v21 = vpop.xlane.xlu1 %162  ;;  %v153_v23 = vpop.xlane.xlu0 %152 }
 0x271   :  { %vm169_vm1 = vcmp.eq.f32.partialorder %v337_v40, %v163_v21 }
 0x2d5   :  { %v86_v2 = vpop.xlane.xlu2 %85 }
 0x2d6   :  { %v87_v5 = vcvt.f32.s32 %v86_v2 }
 0x2d8   :  { %v90_v6 = vadd.s32 %v89_v4, %v87_v5 }
 0x2da   :  { %vm91_vm14 = vcmp.eq.s32.totalorder %v318_v3, %v90_v6 }
 0x2db   :  { %v218_v7 = vsel %vm91_vm14, 1.0, %v285_v22 }
 0x2dc   :  { %v118_v8 = vpack.c.bf16 %v218_v7, %v218_v7 }
 0x2de   :  { %v120_v9 = vsel %vm101_vm4, %v118_v8, 0 }
 0x2df   :  { %129 = vmatpush.bf16.msra.mxu1 %v120_v9 }
 0x2e2   :  { %220 = vmatmul.msk.bf16.vlgmr.msra.gmra.mxu1 %vm97_vm6, %v95_v28  ;;  %v287_v28 = vmov 0  }
 0x35f   :  { %v131_v11 = vpop.f32.mrf.mxu1 }
 0x360   :  { %v222_v12 = vadd.f32 -1.0, %v131_v11 }
 0x362   :  { %v140_v13 = vadd.f32 %v222_v12, %v139_v10 }
 0x364   :  { %vm145_vm15 = vcmp.lt.f32.partialorder %v140_v13, 4.0  ;;  %v164_v16 = vadd.f32 %v158_v47, %v140_v13 }
 0x365   :  { %v224_v14 = vsel %vm145_vm15, 1.0, %v285_v22  ;;  %v170_v22 = vsel %vm169_vm1, %v153_v23, 0.0 }
 0x366   :  { %v148_v15 = vmul.f32 %v224_v14, %v218_v7 }
 0x367   :  { %v133_v17 = vpop.f32.mrf.mxu1 }
 0x368   :  { %v165_v18 = vmul.f32 %v164_v16, %v148_v15  ;;  %v154_v3 = vmul.f32 %v148_v15, %v46_v55 }
 0x36a   :  { %v166_v19 = vsel %vm22_vm0, %v165_v18, 0.0  ;;  %v155_v20 = vsel %vm22_vm0, %v154_v3, 0.0 }
 0x36b   :  { %167 = vadd.xlane.f32.xlu2 %v166_v19  ;;  %156 = vadd.xlane.f32.xlu1 %v155_v20 }
 0x3de   :  { %v168_v24 = vpop.xlane.xlu2 %167  ;;  %v157_v25 = vpop.xlane.xlu1 %156 }
 0x3df   :  { %vm171_vm2 = vcmp.eq.f32.partialorder %v337_v40, %v168_v24 }
 0x3e0   :  { %v172_v26 = vsel %vm171_vm2, %v157_v25, 0.0 }
 0x3e1   :  { %v173_v27 = vadd.f32 %v172_v26, %v170_v22 }
 0x3e3   :  { %vm176_vm0 = vcmp.ne.f32.partialorder %v173_v27, 0.0  ;;  %175 = vst.msk [vmem:[#allocation2] sm:$0xff] %vm174_vm3, %v173_v27 }
 0x3e4   :  { %vm177_vm4 = vmpackc.low %vm176_vm0, %vm176_vm0  ;;  %195 = dma.vmem_to_hbm [thread:$0]  %s191_s19, 128, %s193_s22, [#allocation3]  }
 0x3e5   :  { %v178_v29 = vsel %vm177_vm4, 16711935, %v287_v28 }
 0x3e6   :  { %v180_v30 = vpack.c.b8 %v178_v29, %v178_v29 }
 0x3e8   :  { %vm181_vm6 = vnez %v180_v30 }
 0x3e9   :  { %v182_v31 = vsel %vm181_vm6, 16843009, %v287_v28 }
 0x3ea   :  { %184 = vst.msk [vmem:[#allocation4] sm:$0x3] %vm183_vm5, %v182_v31 }
 0x3eb   :  { %206 = dma.vmem_to_hbm [thread:$0]  %s202_s24, 32, %s204_s3, [#allocation5]  }
 0x3ec   :  { %281 = dma.done.wait [#allocation3], 128  }
 0x3ed   :  { %282 = vsyncadd [#allocation3], 4294967168 }
 0x3ee   :  { %283 = dma.done.wait [#allocation5], 32  }
 0x3ef   :  { %284 = vsyncadd [#allocation5], 4294967264 }
 0x3f0   :  { %215 = vsyncpa [#allocation3], 1 }
 0x3f1   :  { %216 = vsyncpa [#allocation5], 1 }

</bundles_post_ra>
